<compile_context>
chip_gen: v5e
topology: v5e:2x2
jax: 0.10.0
libtpu: 0.0.40
codegen_flags: <defaults>
</compile_context>

<pallas_src>
import functools

import jax
import jax.numpy as jnp
from jax.experimental import pallas as pl
from jax.experimental.pallas import tpu as pltpu

# ---- model constants (the torch module references these globals) ------------
KING_ATTACK_COUNT = 8
NONLINEAR_ITEMS = 2 * KING_ATTACK_COUNT + 2          # 2*KAC king-safety + 2 pawn counts
LINEAR_COUNT = 32                                    # FEATURE_COUNT - NONLINEAR_ITEMS
FEATURE_COUNT = LINEAR_COUNT + NONLINEAR_ITEMS       # = 50

L = LINEAR_COUNT
KAC = KING_ATTACK_COUNT
F = FEATURE_COUNT


def eval_kernel(w_ref, feat_ref, phase_ref, out_ref):
    feat = feat_ref[...]                       # (TB, F)  natural layout, batch on sublanes
    phase = phase_ref[...]                     # (1,  TB) batch on lanes
    w8 = w_ref[...]                            # (8,  F)  packed weight rows (resident)

    # All four dot products + pawn pass-through in one small MXU matmul:
    #   prods[r, b] = sum_f w8[r, f] * feat[b, f]        -> (8, TB), batch on lanes.
    # (contracting the minor dim of both operands == matmul with transposed RHS,
    #  the MXU-native "stream activations" orientation; HIGHEST keeps f32 fidelity)
    prods = jax.lax.dot_general(
        w8, feat,
        dimension_numbers=(((1,), (1,)), ((), ())),
        preferred_element_type=jnp.float32,
        precision=jax.lax.Precision.HIGHEST)

    mg = prods[0:1, :]                         # (1, TB)
    eg = prods[1:2, :]
    ka0_lin = prods[2:3, :]
    ka1_lin = prods[3:4, :]
    pawn0 = prods[4:5, :]
    pawn1 = prods[5:6, :]

    # king_attack = clamp(Linear(ks), 0)^2, side0 - side1
    ka0 = jnp.maximum(ka0_lin, 0.0)
    ka1 = jnp.maximum(ka1_lin, 0.0)
    king_attack = ka0 * ka0 - ka1 * ka1

    # torch.gather(pawns, -1, (eg < 0).long()) -> pawn count of the stronger side
    stronger_side_pawns = jnp.where(eg < 0.0, pawn1, pawn0)
    d = 8.0 - stronger_side_pawns
    eg_scale = (128.0 - d * d) * (1.0 / 128.0)

    # torch.lerp(a, b, w) = a + w * (b - a)
    a = eg * eg_scale
    b = mg + king_attack
    score = a + phase * (b - a)

    # sigmoid(x) = 0.5 * tanh(x/2) + 0.5  (tanh lands on the otherwise-idle EUP)
    out_ref[...] = 0.5 * jnp.tanh(0.5 * score) + 0.5


def _pack_weights(w_mg, w_eg, w_ka):
    """Pack the three weight vectors (+ pawn pass-through) into one (8, F) LHS."""
    w8 = jnp.zeros((8, F), jnp.float32)
    w8 = w8.at[0, 0:L].set(w_mg.reshape(L).astype(jnp.float32))
    w8 = w8.at[1, 0:L].set(w_eg.reshape(L).astype(jnp.float32))
    w8 = w8.at[2, L:L + KAC].set(w_ka.reshape(KAC).astype(jnp.float32))
    w8 = w8.at[3, L + KAC:L + 2 * KAC].set(w_ka.reshape(KAC).astype(jnp.float32))
    w8 = w8.at[4, F - 2].set(1.0)              # pawn0 pass-through
    w8 = w8.at[5, F - 1].set(1.0)              # pawn1 pass-through
    return w8


def _round_up(x, m):
    return (x + m - 1) // m * m


def _choose_tb(batch, tb_req):
    """Batch tile: large (amortize per-step overhead) but >= 2 blocks when possible."""
    if batch <= 128:
        return batch                            # single block == full array dims (legal)
    half = _round_up((batch + 1) // 2, 128)     # keep >= 2 grid blocks (v7x: 2 TCs)
    tb = min(int(tb_req), half)
    return max(128, (tb // 128) * 128)          # multiple of 128 (lane-dense blocks)


@functools.partial(jax.jit, static_argnames=("tb",))
def model_forward(features, phase, w_mg, w_eg, w_ka, *, tb=8192):
    """features: (B, F) f32, phase: (B, 1) f32 -> (B, 1) f32 (same as torch module)."""
    B, Fdim = features.shape
    assert Fdim == F

    feats = features.astype(jnp.float32)                 # natural (B, F): no transpose/pad
    phase_row = phase.astype(jnp.float32).reshape(1, B)  # (B,1)->(1,B): free reshape
    w8 = _pack_weights(w_mg, w_eg, w_ka)

    tb_eff = _choose_tb(B, tb)
    nblk = pl.cdiv(B, tb_eff)                            # ragged last block: Pallas masks it

    out_row = pl.pallas_call(
        eval_kernel,
        out_shape=jax.ShapeDtypeStruct((1, B), jnp.float32),
        grid_spec=pltpu.PrefetchScalarGridSpec(
            num_scalar_prefetch=0,
            grid=(nblk,),
            in_specs=[
                pl.BlockSpec((8, F), lambda i: (0, 0)),        # packed weights (resident)
                pl.BlockSpec((tb_eff, F), lambda i: (i, 0)),   # features, natural layout
                pl.BlockSpec((1, tb_eff), lambda i: (0, i)),   # phase, batch on lanes
            ],
            out_specs=pl.BlockSpec((1, tb_eff), lambda i: (0, i)),
        ),
        compiler_params=pltpu.CompilerParams(
            dimension_semantics=("parallel",),
            vmem_limit_bytes=32 * 1024 * 1024),
    )(w8, feats, phase_row)

    return out_row.reshape(B, 1)                         # (1,B)->(B,1): free reshape


def ref_forward(features, phase, w_mg, w_eg, w_ka):
    """Pure-JAX reference matching the torch module exactly (exact f32 elementwise)."""
    lin = features[:, :L]
    ks = features[:, L:L + 2 * KAC].reshape(-1, 2, KAC)
    pawns = features[:, -2:]
    mg = jnp.sum(lin * w_mg, axis=-1, keepdims=True)
    eg = jnp.sum(lin * w_eg, axis=-1, keepdims=True)
    ka = jnp.maximum(jnp.sum(ks * w_ka, axis=-1), 0.0) ** 2      # (B, 2)
    king_attack = ka[:, 0:1] - ka[:, 1:2]
    stronger = jnp.take_along_axis(pawns, (eg < 0).astype(jnp.int32), axis=-1)
    eg_scale = (128.0 - (8.0 - stronger) ** 2) / 128.0
    a = eg * eg_scale
    score = a + phase * (mg + king_attack - a)
    return 1.0 / (1.0 + jnp.exp(-score))


if __name__ == "__main__":
    key = jax.random.PRNGKey(0)
    kf, kp, k1, k2, k3, kf2, kp2 = jax.random.split(key, 7)

    # ---- test 1: torch init (mg/eg zeros, king_attack ones), B=512 -> 2 blocks
    B = 512
    features = jax.random.uniform(kf, (B, F), dtype=jnp.float32, minval=0.0, maxval=4.0)
    phase = jax.random.uniform(kp, (B, 1), dtype=jnp.float32)

    w_mg0 = jnp.zeros((1, L), dtype=jnp.float32)
    w_eg0 = jnp.zeros((1, L), dtype=jnp.float32)
    w_ka0 = jnp.ones((1, KAC), dtype=jnp.float32)

    out0 = jax.block_until_ready(model_forward(features, phase, w_mg0, w_eg0, w_ka0))
    ref0 = ref_forward(features, phase, w_mg0, w_eg0, w_ka0)
    assert out0.shape == (B, 1)
    assert jnp.allclose(out0, ref0, atol=1e-4, rtol=1e-4)

    # ---- test 2: random weights so the mg/eg paths are exercised too
    w_mg1 = jax.random.normal(k1, (1, L), dtype=jnp.float32) * 0.1
    w_eg1 = jax.random.normal(k2, (1, L), dtype=jnp.float32) * 0.1
    w_ka1 = jax.random.normal(k3, (1, KAC), dtype=jnp.float32) * 0.5

    out1 = jax.block_until_ready(model_forward(features, phase, w_mg1, w_eg1, w_ka1))
    ref1 = ref_forward(features, phase, w_mg1, w_eg1, w_ka1)
    assert jnp.allclose(out1, ref1, atol=1e-4, rtol=1e-4)

    # ---- test 3: ragged batch (B=300 -> blocks of 256 + masked 44) without padding
    B2 = 300
    features2 = jax.random.uniform(kf2, (B2, F), dtype=jnp.float32, minval=0.0, maxval=4.0)
    phase2 = jax.random.uniform(kp2, (B2, 1), dtype=jnp.float32)
    out2 = jax.block_until_ready(model_forward(features2, phase2, w_mg1, w_eg1, w_ka1))
    ref2 = ref_forward(features2, phase2, w_mg1, w_eg1, w_ka1)
    assert out2.shape == (B2, 1)
    assert jnp.allclose(out2, ref2, atol=1e-4, rtol=1e-4)

    print("KERNEL_OK")
</pallas_src>

<mosaic_0001>
module attributes {stable_mosaic.version = 11 : i64} {
  func.func @eval_kernel(%arg0: i32, %arg1: memref<8x50xf32, #tpu.memory_space<vmem>>, %arg2: memref<256x50xf32, #tpu.memory_space<vmem>>, %arg3: memref<1x256xf32, #tpu.memory_space<vmem>>, %arg4: memref<1x256xf32, #tpu.memory_space<vmem>>) attributes {dimension_semantics = [#tpu.dimension_semantics<parallel>], iteration_bounds = array<i64: 2>, scalar_prefetch = 0 : i64, scratch_operands = 0 : i64, tpu.core_type = #tpu.core_type<tc>, window_params = [{pipeline_mode = #tpu.pipeline_mode<synchronous>, transform_indices = @transform_0, window_bounds = array<i64: 8, 50>}, {transform_indices = @transform_1, window_bounds = array<i64: 256, 50>}, {transform_indices = @transform_2, window_bounds = array<i64: 1, 256>}, {transform_indices = @transform_3, window_bounds = array<i64: 1, 256>}]} {
    %c0 = arith.constant 0 : index
    %c0_0 = arith.constant 0 : index
    %0 = vector.load %arg2[%c0, %c0_0] : memref<256x50xf32, #tpu.memory_space<vmem>>, vector<256x50xf32>
    %c0_1 = arith.constant 0 : index
    %c0_2 = arith.constant 0 : index
    %1 = vector.load %arg3[%c0_1, %c0_2] : memref<1x256xf32, #tpu.memory_space<vmem>>, vector<1x256xf32>
    %c0_3 = arith.constant 0 : index
    %c0_4 = arith.constant 0 : index
    %2 = vector.load %arg1[%c0_3, %c0_4] : memref<8x50xf32, #tpu.memory_space<vmem>>, vector<8x50xf32>
    %cst = arith.constant dense<0.000000e+00> : vector<8x256xf32>
    %3 = tpu.matmul %2, %0, %cst {dimension_numbers = #tpu.dot_dimension_numbers<[1], [1], [0], [0], [0, 0, 1, 0], [], []>, precision = #tpu.contract_precision<fp32>} : vector<8x50xf32>, vector<256x50xf32>, vector<8x256xf32> -> vector<8x256xf32>
    %4 = vector.extract_strided_slice %3 {offsets = [0, 0], sizes = [1, 256], strides = [1, 1]} : vector<8x256xf32> to vector<1x256xf32>
    %5 = vector.extract_strided_slice %3 {offsets = [1, 0], sizes = [1, 256], strides = [1, 1]} : vector<8x256xf32> to vector<1x256xf32>
    %6 = vector.extract_strided_slice %3 {offsets = [2, 0], sizes = [1, 256], strides = [1, 1]} : vector<8x256xf32> to vector<1x256xf32>
    %7 = vector.extract_strided_slice %3 {offsets = [3, 0], sizes = [1, 256], strides = [1, 1]} : vector<8x256xf32> to vector<1x256xf32>
    %8 = vector.extract_strided_slice %3 {offsets = [4, 0], sizes = [1, 256], strides = [1, 1]} : vector<8x256xf32> to vector<1x256xf32>
    %9 = vector.extract_strided_slice %3 {offsets = [5, 0], sizes = [1, 256], strides = [1, 1]} : vector<8x256xf32> to vector<1x256xf32>
    %cst_5 = arith.constant 0.000000e+00 : f32
    %10 = vector.broadcast %cst_5 : f32 to vector<1x256xf32>
    %11 = arith.maximumf %6, %10 : vector<1x256xf32>
    %cst_6 = arith.constant 0.000000e+00 : f32
    %12 = vector.broadcast %cst_6 : f32 to vector<1x256xf32>
    %13 = arith.maximumf %7, %12 : vector<1x256xf32>
    %14 = arith.mulf %11, %11 : vector<1x256xf32>
    %15 = arith.mulf %13, %13 : vector<1x256xf32>
    %16 = arith.subf %14, %15 : vector<1x256xf32>
    %cst_7 = arith.constant 0.000000e+00 : f32
    %17 = vector.broadcast %cst_7 : f32 to vector<1x256xf32>
    %18 = arith.cmpf olt, %5, %17 : vector<1x256xf32>
    %19 = arith.select %18, %9, %8 : vector<1x256xi1>, vector<1x256xf32>
    %cst_8 = arith.constant 8.000000e+00 : f32
    %20 = vector.broadcast %cst_8 : f32 to vector<1x256xf32>
    %21 = arith.subf %20, %19 : vector<1x256xf32>
    %22 = arith.mulf %21, %21 : vector<1x256xf32>
    %cst_9 = arith.constant 1.280000e+02 : f32
    %23 = vector.broadcast %cst_9 : f32 to vector<1x256xf32>
    %24 = arith.subf %23, %22 : vector<1x256xf32>
    %cst_10 = arith.constant 7.812500e-03 : f32
    %25 = vector.broadcast %cst_10 : f32 to vector<1x256xf32>
    %26 = arith.mulf %24, %25 : vector<1x256xf32>
    %27 = arith.mulf %5, %26 : vector<1x256xf32>
    %28 = arith.addf %4, %16 : vector<1x256xf32>
    %29 = arith.subf %28, %27 : vector<1x256xf32>
    %30 = arith.mulf %1, %29 : vector<1x256xf32>
    %31 = arith.addf %27, %30 : vector<1x256xf32>
    %cst_11 = arith.constant 5.000000e-01 : f32
    %32 = vector.broadcast %cst_11 : f32 to vector<1x256xf32>
    %33 = arith.mulf %32, %31 : vector<1x256xf32>
    %34 = math.tanh %33 : vector<1x256xf32>
    %cst_12 = arith.constant 5.000000e-01 : f32
    %35 = vector.broadcast %cst_12 : f32 to vector<1x256xf32>
    %36 = arith.mulf %35, %34 : vector<1x256xf32>
    %cst_13 = arith.constant 5.000000e-01 : f32
    %37 = vector.broadcast %cst_13 : f32 to vector<1x256xf32>
    %38 = arith.addf %36, %37 : vector<1x256xf32>
    %c0_14 = arith.constant 0 : index
    %c0_15 = arith.constant 0 : index
    %39 = vector.load %arg4[%c0_14, %c0_15] : memref<1x256xf32, #tpu.memory_space<vmem>>, vector<1x256xf32>
    tpu.vector_store %arg4[%c0_14, %c0_15], %38 {strides = array<i32>} : memref<1x256xf32, #tpu.memory_space<vmem>>, vector<1x256xf32>,
    return
  }
  func.func @transform_0(%arg0: i32) -> (i32, i32) {
    %c0_i32 = arith.constant 0 : i32
    %c0_i32_0 = arith.constant 0 : i32
    %c0_i32_1 = arith.constant 0 : i32
    return %c0_i32, %c0_i32_0 : i32, i32
  }
  func.func @transform_1(%arg0: i32) -> (i32, i32) {
    %c0_i32 = arith.constant 0 : i32
    %c0_i32_0 = arith.constant 0 : i32
    return %arg0, %c0_i32 : i32, i32
  }
  func.func @transform_2(%arg0: i32) -> (i32, i32) {
    %c0_i32 = arith.constant 0 : i32
    %c0_i32_0 = arith.constant 0 : i32
    return %c0_i32, %arg0 : i32, i32
  }
  func.func @transform_3(%arg0: i32) -> (i32, i32) {
    %c0_i32 = arith.constant 0 : i32
    %c0_i32_0 = arith.constant 0 : i32
    return %c0_i32, %arg0 : i32, i32
  }
}

</mosaic_0001>

<bundles_post_ra>
// kernel: model_forward.1
= control target key start
LH: loop header
LB: loop body
LE: loop exit
PB: predicated region body
PF: predicated region fallthrough
CT: control target
= control target key end

     0   :  { %8 = vsyncpa [#allocation3], 0  ;;  %s1982_s0 = inlined_call_operand.vmem [shape: f32[8,50], index: 0, kind: input, shape index: {}]   ;;  %s1983_s1 = inlined_call_operand.vmem [shape: f32[512,50], index: 1, kind: input, shape index: {}]   ;;  %s1984_s2 = inlined_call_operand.vmem [shape: f32[1,512], index: 2, kind: input, shape index: {}]   ;;  %s1985_s3 = inlined_call_operand.hbm [shape: f32[1,512], index: 3, kind: output, shape index: {}]  }
   0x1   :  { %10 = vsyncpa [#allocation3 + $0x1], 0  ;;  %s1316_s12 = smov 0   ;;  %s1318_s13 = smov 0  }
   0x2   :  { %s1320_s14 = smov 0   ;;  %s1322_s15 = smov 0  }
   0x3 LB: > { %s1337_s16 = sadd.s32 4294967295, %s1294_s15   ;;  %s1177_s17 = sadd.s32 4294967294, %s1294_s15   ;;  %s1294_s15 = sphi %s1322_s15, %s2019_s15   ;;  %s1290_s14 = sphi %s1320_s14, %s2018_s14   ;;  %s1286_s13 = sphi %s1318_s13, %s2017_s13   ;;  %s1282_s12 = sphi %s1316_s12, %s2016_s12  }
   0x4   : > { %s1341_s18 = sadd.s32 1, %s1294_s15   ;;  %s96_s19 = sadd.s32 1, %s1290_s14 }
   0x5   : > { %s93_s20 = ssub.s32 %s1294_s15, %s1341_s18  ;;  %p106_p0 = scmp.ne.s32.totalorder %s1290_s14, %s1286_s13 }
   0x6   : > { %p94_p1 = scmp.eq.s32.totalorder %s93_s20, 0  ;;  %p107_p2 = scmp.eq.s32.totalorder %s1337_s16, 1 }
   0x7   : > { %p112_p3 = scmp.ne.s32.totalorder %s1286_s13, %s1282_s12  ;;  %p113_p4 = scmp.eq.s32.totalorder %s1177_s17, 1 }
   0x8   : > { %s1352_s21 = scalar_select %p94_p1, %s1290_s14, %s96_s19  }
   0x9   : > { %p1354_p5 = por %p107_p2, %p106_p0  ;;  %p1358_p6 = por %p113_p4, %p112_p3 }
   0xa   : > { %p1180_p7 = scmp.ge.s32.totalorder %s1294_s15, 1  ;;  %p151_p8 = scmp.lt.s32.totalorder %s1294_s15, 3 }
   0xc   : > { %p152_p9 = pnand %p1180_p7, %p151_p8 }
   0xd   : > { %s1182_s24 = sshll.u32 (!%p152_p9), %s1337_s16, 5  ;;  %s1943_s4 = sshll.u32 (!%p152_p9), %s1337_s16, 1 }
   0xe   : > { %155 = sbr.rel (%p152_p9) target bundleno = 408 (0x198), region = 32  ;;  %p180_p10 = scmp.lt.s32.totalorder (!%p152_p9), %s1182_s24, 63 }
   0xf   : > { %p186_p11 = scmp.lt.s32.totalorder (!%p152_p9), %s1943_s4, 3  ;;  %s176_s9 = sand.u32 (!%p152_p9), 1, %s1286_s13  }
  0x10   : > { %s1181_s10 = sshll.u32 (!%p152_p9), %s176_s9, 1  ;;  %s1104_s17 = scalar_lea.hbm (!%p152_p9), %s1985_s3, %s1943_s4 }
  0x11   : > { %s178_s19 = scalar_lea.vmem (!%p152_p9), [#allocation2], %s1181_s10  ;;  %s1252_s30 = scalar_lea.hbm (!%p152_p9), %s1985_s3, 4 }
  0x12   : > { %s1106_s20 = sshll.u32 (!%p152_p9), %s178_s19, 4  ;;  %s1107_s20 = int_to_ptr.vmem [resolvable:$true] %s1106_s20 }
  0x13   : > { %s2021_s24 = smov (!%p180_p10, %s1182_s24), 63  ;;  %vm225_vm0 = vcmask 408576   ;;  %vm1062_vm3 = vcmask 1040384  }
  0x14   : > { %s1183_s25 = sshll.u32 %s2021_s24, 3  ;;  %s1108_s24 = sshll.u32 %s1104_s17, 4  ;;  %s1109_s24 = int_to_ptr.hbm [resolvable:$true] %s1108_s24 }
  0x15   : > { %s1368_s28 = scalar_lea.vmem %s1983_s1, %s1183_s25  ;;  %s1094_s25 = scalar_lea.sflag [#allocation3], %s176_s9 }
  0x16   : > { %v206_v0 = vld [vmem:[%s1368_s28 + $0x78] sm:$0xff]  ;;  %v205_v1 = vld [vmem:[%s1368_s28 + $0x70] sm:$0xff]  ;;  %v204_v2 = vld [vmem:[%s1368_s28 + $0x68] sm:$0xff]  ;;  %s187_s5 = scalar_select %p186_p11, %s1943_s4, 3 }
  0x17   : > { %v275_v3 = vsel %vm225_vm0, %v206_v0, 0  ;;  %v272_v4 = vsel %vm225_vm0, %v205_v1, 0  ;;  %v269_v5 = vsel %vm225_vm0, %v204_v2, 0  ;;  %v203_v6 = vld [vmem:[%s1368_s28 + $0x60] sm:$0xff]  ;;  %v202_v7 = vld [vmem:[%s1368_s28 + $0x58] sm:$0xff]  ;;  %v201_v17 = vld [vmem:[%s1368_s28 + $0x50] sm:$0xff] }
  0x18   : > { %v1378_v8 = vand.u32 4294901760, %v275_v3  ;;  %v1380_v9 = vand.u32 4294901760, %v272_v4  ;;  %v1382_v10 = vand.u32 4294901760, %v269_v5  ;;  %v266_v11 = vsel %vm225_vm0, %v203_v6, 0  ;;  %v200_v26 = vld [vmem:[%s1368_s28 + $0x48] sm:$0xff]  ;;  %v199_v34 = vld [vmem:[%s1368_s28 + $0x40] sm:$0xff]  ;;  %s188_s8 = scalar_lea.vmem %s1984_s2, %s187_s5 }
  0x19   : > { %v1385_v12 = vand.u32 4294901760, %v266_v11  ;;  %v263_v16 = vsel %vm225_vm0, %v202_v7, 0  ;;  %v260_v21 = vsel %vm225_vm0, %v201_v17, 0  ;;  %v257_v29 = vsel %vm225_vm0, %v200_v26, 0  ;;  %v198_v41 = vld [vmem:[%s1368_s28 + $0x38] sm:$0xff]  ;;  %v197_v48 = vld [vmem:[%s1368_s28 + $0x30] sm:$0xff] }
  0x1a   : > { %326 = vmatpush.xpose.msra.mxu0 %v1378_v8  ;;  %v1389_v13 = vsub.f32 %v275_v3, %v1378_v8  ;;  %522 = vmatpush.xpose.msra.mxu3 %v1378_v8  ;;  %v1393_v14 = vsub.f32 %v272_v4, %v1380_v9  ;;  %v1396_v15 = vsub.f32 %v269_v5, %v1382_v10  ;;  %v1403_v20 = vand.u32 4294901760, %v263_v16  ;;  %v196_v55 = vld [vmem:[%s1368_s28 + $0x28] sm:$0xff]  ;;  %v195_v62 = vld [vmem:[%s1368_s28 + $0x20] sm:$0xff]  ;;  %v194_v5 = vld [vmem:[%s1368_s28 + $0x18] sm:$0xff]  ;;  %s1246_s26 = sshra.s32 %s1109_s24, 4  ;;  %s1247_s26 = int_to_ptr.hbm [resolvable:$true] %s1246_s26 }
  0x1b   : > { %v1416_v25 = vsub.f32 %v266_v11, %v1385_v12  ;;  %v1420_v28 = vand.u32 4294901760, %v260_v21  ;;  %v1434_v35 = vand.u32 4294901760, %v257_v29  ;;  %v254_v36 = vsel %vm225_vm0, %v199_v34, 0  ;;  %s1248_s27 = scalar_lea.hbm %s1247_s26, 2  ;;  %p1253_p1 = scmp.lt.s32.totalorder %s1247_s26, %s1985_s3 }
  0x1c   : > { %469 = vmatpush.xpose.msra.mxu2 %v1389_v13  ;;  %v368_v18 = vand.u32 4294901760, %v1389_v13  ;;  %v374_v19 = vand.u32 4294901760, %v1393_v14  ;;  %v380_v24 = vand.u32 4294901760, %v1396_v15  ;;  %v1429_v33 = vsub.f32 %v263_v16, %v1403_v20  ;;  %p1249_p12 = scmp.ne.s32.totalorder %s1247_s26, %s1248_s27  ;;  %p1254_p2 = scmp.lt.s32.totalorder %s1252_s30, %s1248_s27 }
  0x1d   : > { %v386_v32 = vand.u32 4294901760, %v1416_v25  ;;  %v1443_v40 = vsub.f32 %v260_v21, %v1420_v28  ;;  %v1449_v42 = vsub.f32 %v257_v29, %v1434_v35  ;;  %v1451_v43 = vand.u32 4294901760, %v254_v36 }
  0x1e   : > { %328 = vmatpush.xpose.msra.mxu0 %v1380_v9  ;;  %v369_v22 = vsub.f32 %v1389_v13, %v368_v18  ;;  %524 = vmatpush.xpose.msra.mxu3 %v1380_v9  ;;  %v375_v23 = vsub.f32 %v1393_v14, %v374_v19  ;;  %v381_v31 = vsub.f32 %v1396_v15, %v380_v24  ;;  %v392_v39 = vand.u32 4294901760, %v1429_v33  ;;  %p1250_p13 = pnand %p1249_p12, %p1354_p5  ;;  %p1255_p3 = por %p1254_p2, %p1253_p1 }
  0x1f   : > { %v387_v38 = vsub.f32 %v1416_v25, %v386_v32  ;;  %v398_v46 = vand.u32 4294901760, %v1443_v40  ;;  %v251_v47 = vsel %vm225_vm0, %v198_v41, 0  ;;  %v404_v49 = vand.u32 4294901760, %v1449_v42  ;;  %v221_v41 = vld [vmem:[%s1368_s28 + $0xf0] sm:$0xff] }
  0x20   : > { %v370_v27 = vand.u32 4294901760, %v369_v22  ;;  %472 = vmatpush.xpose.msra.mxu2 %v1393_v14  ;;  %v376_v30 = vand.u32 4294901760, %v375_v23  ;;  %v382_v37 = vand.u32 4294901760, %v381_v31  ;;  %v393_v45 = vsub.f32 %v1429_v33, %v392_v39  ;;  %v193_v22 = vld [vmem:[%s1368_s28 + $0x10] sm:$0xff]  ;;  %v222_v31 = vld [vmem:[%s1368_s28 + $0xf8] sm:$0xff]  ;;  %p1251_p0 = pneg %p1250_p13 }
  0x21   : > { %v388_v44 = vand.u32 4294901760, %v387_v38  ;;  %v1464_v50 = vsub.f32 %v254_v36, %v1451_v43  ;;  %v399_v52 = vsub.f32 %v1443_v40, %v398_v46  ;;  %v1470_v53 = vand.u32 4294901760, %v251_v47  ;;  %v192_v36 = vld [vmem:[%s1368_s28 + $0x8] sm:$0xff]  ;;  %v214_v14 = vld [vmem:[%s1368_s28 + $0xb8] sm:$0xff] }
  0x22   : > { %371 = vmatpush.xpose.msra.mxu1 %v370_v27  ;;  %330 = vmatpush.xpose.msra.mxu0 %v1382_v10  ;;  %v394_v51 = vand.u32 4294901760, %v393_v45  ;;  %v248_v54 = vsel %vm225_vm0, %v197_v48, 0  ;;  %v405_v56 = vsub.f32 %v1449_v42, %v404_v49  ;;  %v245_v61 = vsel %vm225_vm0, %v196_v55, 0  ;;  %p1256_p4 = pnand %p1255_p3, %p1251_p0 }
  0x23   : > { %526 = vmatpush.xpose.msra.mxu3 %v1382_v10  ;;  %v410_v57 = vand.u32 4294901760, %v1464_v50  ;;  %v400_v58 = vand.u32 4294901760, %v399_v52  ;;  %v1482_v59 = vsub.f32 %v251_v47, %v1470_v53  ;;  %v1484_v60 = vand.u32 4294901760, %v248_v54  ;;  %v191_v52 = vld [vmem:[%s1368_s28] sm:$0xff] }
  0x24   : > { %475 = vmatpush.xpose.msra.mxu2 %v1396_v15  ;;  %v406_v63 = vand.u32 4294901760, %v405_v56  ;;  %v1498_v3 = vand.u32 4294901760, %v245_v61  ;;  %v242_v4 = vsel %vm225_vm0, %v195_v62, 0  ;;  %v239_v21 = vsel %vm225_vm0, %v194_v5, 0 }
  0x25   : > { %v411_v0 = vsub.f32 %v1464_v50, %v410_v57  ;;  %v416_v1 = vand.u32 4294901760, %v1482_v59  ;;  %v1496_v2 = vsub.f32 %v248_v54, %v1484_v60  ;;  %v1504_v6 = vand.u32 4294901760, %v242_v4 }
  0x26   : > { %377 = vmatpush.xpose.msra.mxu1 %v376_v30  ;;  %332 = vmatpush.xpose.msra.mxu0 %v1385_v12  ;;  %v1512_v17 = vsub.f32 %v245_v61, %v1498_v3  ;;  %v1526_v30 = vand.u32 4294901760, %v239_v21  ;;  %v236_v34 = vsel %vm225_vm0, %v193_v22, 0  ;;  %v323_v38 = vsel %vm225_vm0, %v222_v31, 0 }
  0x27   : > { %528 = vmatpush.xpose.msra.mxu3 %v1385_v12  ;;  %v412_v7 = vand.u32 4294901760, %v411_v0  ;;  %v417_v11 = vsub.f32 %v1482_v59, %v416_v1  ;;  %v1992_v16 = vand.u32 4294901760, %v1496_v2  ;;  %v1519_v23 = vsub.f32 %v242_v4, %v1504_v6 }
  0x28   : > { %478 = vmatpush.xpose.msra.mxu2 %v1416_v25  ;;  %v1991_v29 = vand.u32 4294901760, %v1512_v17  ;;  %v1541_v47 = vsub.f32 %v239_v21, %v1526_v30  ;;  %v1543_v48 = vand.u32 4294901760, %v236_v34  ;;  %v1549_v54 = vand.u32 4294901760, %v323_v38  ;;  %v212_v25 = vld [vmem:[%s1368_s28 + $0xa8] sm:$0xff] }
  0x29   : > { %v418_v26 = vand.u32 4294901760, %v417_v11  ;;  %v423_v27 = vsub.f32 %v1496_v2, %v1992_v16  ;;  %v320_v55 = vsel %vm225_vm0, %v221_v41, 0  ;;  %v230_v4 = vsel %vm225_vm0, %v191_v52, 0 }
  0x2a   : > { %383 = vmatpush.xpose.msra.mxu1 %v382_v37  ;;  %334 = vmatpush.xpose.msra.mxu0 %v1403_v20  ;;  %v1989_v37 = vand.u32 4294901760, %v1519_v23  ;;  %v429_v45 = vsub.f32 %v1512_v17, %v1991_v29  ;;  %v1987_v62 = vand.u32 4294901760, %v1541_v47  ;;  %v1565_v5 = vand.u32 4294901760, %v320_v55  ;;  %v216_v29 = vld [vmem:[%s1368_s28 + $0xc8] sm:$0xff] }
  0x2b   : > { %530 = vmatpush.xpose.msra.mxu3 %v1403_v20  ;;  %v1580_v31 = vand.u32 4294901760, %v230_v4  ;;  %v305_v13 = vsel %vm225_vm0, %v216_v29, 0 }
  0x2c   : > { %481 = vmatpush.xpose.msra.mxu2 %v1429_v33  ;;  %v435_v56 = vsub.f32 %v1519_v23, %v1989_v37  ;;  %v430_v61 = vand.u32 4294901760, %v429_v45  ;;  %v441_v22 = vsub.f32 %v1541_v47, %v1987_v62  ;;  %v217_v62 = vld [vmem:[%s1368_s28 + $0xd0] sm:$0xff]  ;;  %v293_v33 = vsel %vm225_vm0, %v212_v25, 0 }
  0x2e   : > { %389 = vmatpush.xpose.msra.mxu1 %v388_v44  ;;  %336 = vmatpush.xpose.msra.mxu0 %v1420_v28  ;;  %v424_v44 = vand.u32 4294901760, %v423_v27  ;;  %v436_v21 = vand.u32 4294901760, %v435_v56  ;;  %v442_v45 = vand.u32 4294901760, %v441_v22  ;;  %v218_v56 = vld [vmem:[%s1368_s28 + $0xd8] sm:$0xff] }
  0x2f   : > { %532 = vmatpush.xpose.msra.mxu3 %v1420_v28 }
  0x30   : > { %484 = vmatpush.xpose.msra.mxu2 %v1443_v40  ;;  %v210_v40 = vld [vmem:[%s1368_s28 + $0x98] sm:$0xff] }
  0x32   : > { %395 = vmatpush.xpose.msra.mxu1 %v394_v51  ;;  %338 = vmatpush.xpose.msra.mxu0 %v1434_v35  ;;  %v233_v51 = vsel %vm225_vm0, %v192_v36, 0  ;;  %v1585_v36 = vsub.f32 %v320_v55, %v1565_v5  ;;  %v1598_v55 = vsub.f32 %v230_v4, %v1580_v31  ;;  %v311_v4 = vsel %vm225_vm0, %v218_v56, 0 }
  0x33   : > { %534 = vmatpush.xpose.msra.mxu3 %v1434_v35  ;;  %v1561_v0 = vand.u32 4294901760, %v233_v51  ;;  %v1628_v56 = vand.u32 4294901760, %v311_v4 }
  0x34   : > { %487 = vmatpush.xpose.msra.mxu2 %v1449_v42  ;;  %v209_v42 = vld [vmem:[%s1368_s28 + $0x90] sm:$0xff] }
  0x35   : > { %v1578_v27 = vsub.f32 %v233_v51, %v1561_v0 }
  0x36   : > { %401 = vmatpush.xpose.msra.mxu1 %v400_v58  ;;  %340 = vmatpush.xpose.msra.mxu0 %v1451_v43  ;;  %v220_v58 = vld [vmem:[%s1368_s28 + $0xe8] sm:$0xff] }
  0x37   : > { %536 = vmatpush.xpose.msra.mxu3 %v1451_v43  ;;  %v317_v11 = vsel %vm225_vm0, %v220_v58, 0  ;;  %v1990_v52 = vand.u32 4294901760, %v1578_v27  ;;  %v1993_v58 = vand.u32 4294901760, %v1585_v36 }
  0x38   : > { %490 = vmatpush.xpose.msra.mxu2 %v1464_v50  ;;  %v208_v50 = vld [vmem:[%s1368_s28 + $0x88] sm:$0xff] }
  0x3a   : > { %407 = vmatpush.xpose.msra.mxu1 %v406_v63  ;;  %342 = vmatpush.xpose.msra.mxu0 %v1470_v53  ;;  %v1559_v63 = vsub.f32 %v236_v34, %v1543_v48  ;;  %v219_v34 = vld [vmem:[%s1368_s28 + $0xe0] sm:$0xff] }
  0x3b   : > { %538 = vmatpush.xpose.msra.mxu3 %v1470_v53 }
  0x3c   : > { %493 = vmatpush.xpose.msra.mxu2 %v1482_v59  ;;  %v2002_v59 = vand.u32 4294901760, %v1496_v2 }
  0x3e   : > { %413 = vmatpush.xpose.msra.mxu1 %v412_v7  ;;  %344 = vmatpush.xpose.msra.mxu0 %v1484_v60  ;;  %v1569_v7 = vsub.f32 %v323_v38, %v1549_v54  ;;  %v1587_v38 = vand.u32 4294901760, %v317_v11 }
  0x3f   : > { %540 = vmatpush.xpose.msra.mxu3 %v1484_v60 }
  0x40   : > { %496 = vmatpush.xpose.msra.mxu2 %v1496_v2  ;;  %v1988_v41 = vand.u32 4294901760, %v1569_v7  ;;  %v2003_v2 = vand.u32 4294901760, %v1512_v17 }
  0x42   : > { %419 = vmatpush.xpose.msra.mxu1 %v418_v26  ;;  %346 = vmatpush.xpose.msra.mxu0 %v1498_v3  ;;  %v1986_v26 = vand.u32 4294901760, %v1559_v63 }
  0x43   : > { %542 = vmatpush.xpose.msra.mxu3 %v1498_v3 }
  0x44   : > { %499 = vmatpush.xpose.msra.mxu2 %v1512_v17  ;;  %v447_v51 = vsub.f32 %v1559_v63, %v1986_v26  ;;  %v1995_v26 = vand.u32 4294901760, %v1598_v55 }
  0x46   : > { %425 = vmatpush.xpose.msra.mxu1 %v424_v44  ;;  %348 = vmatpush.xpose.msra.mxu0 %v1504_v6  ;;  %v314_v44 = vsel %vm225_vm0, %v219_v34, 0  ;;  %v448_v34 = vand.u32 4294901760, %v447_v51 }
  0x47   : > { %544 = vmatpush.xpose.msra.mxu3 %v1504_v6  ;;  %v1610_v22 = vand.u32 4294901760, %v314_v44 }
  0x48   : > { %502 = vmatpush.xpose.msra.mxu2 %v1519_v23 }
  0x49   : > { %v1626_v51 = vsub.f32 %v314_v44, %v1610_v22 }
  0x4a   : > { %431 = vmatpush.xpose.msra.mxu1 %v430_v61  ;;  %350 = vmatpush.xpose.msra.mxu0 %v1526_v30  ;;  %v1604_v61 = vsub.f32 %v317_v11, %v1587_v38  ;;  %v453_v11 = vsub.f32 %v1578_v27, %v1990_v52  ;;  %v308_v52 = vsel %vm225_vm0, %v217_v62, 0 }
  0x4b   : > { %546 = vmatpush.xpose.msra.mxu3 %v1526_v30 }
  0x4c   : > { %505 = vmatpush.xpose.msra.mxu2 %v1541_v47  ;;  %v1994_v37 = vand.u32 4294901760, %v1604_v61  ;;  %v454_v16 = vand.u32 4294901760, %v453_v11  ;;  %v1647_v11 = vand.u32 4294901760, %v308_v52 }
  0x4e   : > { %437 = vmatpush.xpose.msra.mxu1 %v436_v21  ;;  %352 = vmatpush.xpose.msra.mxu0 %v1543_v48  ;;  %v710_v21 = vsub.f32 %v1569_v7, %v1988_v41  ;;  %v716_v41 = vsub.f32 %v1585_v36, %v1993_v58  ;;  %v459_v58 = vsub.f32 %v1598_v55, %v1995_v26 }
  0x4f   : > { %548 = vmatpush.xpose.msra.mxu3 %v1543_v48  ;;  %v722_v62 = vsub.f32 %v1604_v61, %v1994_v37  ;;  %v1661_v29 = vsub.f32 %v308_v52, %v1647_v11 }
  0x50   : > { %508 = vmatpush.xpose.msra.mxu2 %v1559_v63  ;;  %v717_v44 = vand.u32 4294901760, %v716_v41  ;;  %v460_v41 = vand.u32 4294901760, %v459_v58 }
  0x51   : > { %v723_v37 = vand.u32 4294901760, %v722_v62  ;;  %v739_v62 = vand.u32 4294901760, %v1661_v29 }
  0x52   : > { %443 = vmatpush.xpose.msra.mxu1 %v442_v45  ;;  %354 = vmatpush.xpose.msra.mxu0 %v1561_v0  ;;  %v711_v45 = vand.u32 4294901760, %v710_v21  ;;  %v727_v21 = vand.u32 4294901760, %v1626_v51 }
  0x53   : > { %550 = vmatpush.xpose.msra.mxu3 %v1561_v0 }
  0x54   : > { %511 = vmatpush.xpose.msra.mxu2 %v1578_v27 }
  0x56   : > { %449 = vmatpush.xpose.msra.mxu1 %v448_v34  ;;  %356 = vmatpush.xpose.msra.mxu0 %v1580_v31  ;;  %v1645_v34 = vsub.f32 %v311_v4, %v1628_v56  ;;  %v728_v4 = vsub.f32 %v1626_v51, %v727_v21 }
  0x57   : > { %552 = vmatpush.xpose.msra.mxu3 %v1580_v31 }
  0x58   : > { %514 = vmatpush.xpose.msra.mxu2 %v1598_v55  ;;  %v733_v26 = vand.u32 4294901760, %v1645_v34 }
  0x5a   : > { %563 = vmatpush.xpose.msrb.mxu0 %v368_v18  ;;  %v215_v18 = vld [vmem:[%s1368_s28 + $0xc0] sm:$0xff]  ;;  %455 = vmatpush.xpose.msra.mxu1 %v454_v16  ;;  %v734_v52 = vsub.f32 %v1645_v34, %v733_v26 }
  0x5b   : > { %712 = vmatpush.xpose.msrb.mxu3 %v711_v45  ;;  %v1654_v45 = vand.u32 4294901760, %v305_v13  ;;  %v302_v16 = vsel %vm225_vm0, %v215_v18, 0  ;;  %v299_v18 = vsel %vm225_vm0, %v214_v14, 0 }
  0x5c   : > { %667 = vmatpush.xpose.msrb.mxu2 %v1549_v54  ;;  %v1672_v58 = vand.u32 4294901760, %v302_v16 }
  0x5e   : > { %567 = vmatpush.xpose.msrb.mxu0 %v374_v19  ;;  %461 = vmatpush.xpose.msra.mxu1 %v460_v41  ;;  %v1670_v19 = vsub.f32 %v305_v13, %v1654_v45  ;;  %v735_v13 = vand.u32 4294901760, %v734_v52  ;;  %v740_v41 = vsub.f32 %v1661_v29, %v739_v62 }
  0x5f   : > { %718 = vmatpush.xpose.msrb.mxu3 %v717_v44  ;;  %v729_v44 = vand.u32 4294901760, %v728_v4 }
  0x60   : > { %669 = vmatpush.xpose.msrb.mxu2 %v1565_v5  ;;  %v1996_v15 = vand.u32 4294901760, %v1670_v19  ;;  %v741_v14 = vand.u32 4294901760, %v740_v41 }
  0x62   : > { %630 = vmatpush.xpose.msrb.mxu1 %v1378_v8  ;;  %571 = vmatpush.xpose.msrb.mxu0 %v380_v24  ;;  %v213_v8 = vld [vmem:[%s1368_s28 + $0xb0] sm:$0xff]  ;;  %v1686_v24 = vsub.f32 %v302_v16, %v1672_v58 }
  0x63   : > { %724 = vmatpush.xpose.msrb.mxu3 %v723_v37  ;;  %v1688_v37 = vand.u32 4294901760, %v299_v18 }
  0x64   : > { %671 = vmatpush.xpose.msrb.mxu2 %v1587_v38  ;;  %v1997_v4 = vand.u32 4294901760, %v1686_v24 }
  0x65   : > { %v1704_v16 = vsub.f32 %v299_v18, %v1688_v37 }
  0x66   : > { %632 = vmatpush.xpose.msrb.mxu1 %v1380_v9  ;;  %575 = vmatpush.xpose.msrb.mxu0 %v386_v32  ;;  %v296_v9 = vsel %vm225_vm0, %v213_v8, 0  ;;  %v746_v32 = vsub.f32 %v1670_v19, %v1996_v15  ;;  %v1727_v15 = vand.u32 4294901760, %v293_v33 }
  0x67   : > { %730 = vmatpush.xpose.msrb.mxu3 %v729_v44  ;;  %v1706_v44 = vand.u32 4294901760, %v296_v9  ;;  %v1998_v41 = vand.u32 4294901760, %v1704_v16 }
  0x68   : > { %673 = vmatpush.xpose.msrb.mxu2 %v1610_v22  ;;  %v747_v18 = vand.u32 4294901760, %v746_v32 }
  0x69   : > { %v1725_v25 = vsub.f32 %v296_v9, %v1706_v44 }
  0x6a   : > { %634 = vmatpush.xpose.msrb.mxu1 %v1382_v10  ;;  %579 = vmatpush.xpose.msrb.mxu0 %v392_v39  ;;  %v224_v10 = vld [vmem:[%s1982_s0] sm:$0xff] }
  0x6b   : > { %736 = vmatpush.xpose.msrb.mxu3 %v735_v13  ;;  %v211_v39 = vld [vmem:[%s1368_s28 + $0xa0] sm:$0xff]  ;;  %v227_v52 = vsel %vm225_vm0, %v224_v10, 0  ;;  %v752_v13 = vsub.f32 %v1686_v24, %v1997_v4 }
  0x6c   : > { %675 = vmatpush.xpose.msrb.mxu2 %v1628_v56  ;;  %v1715_v8 = vand.u32 4294901760, %v227_v52  ;;  %v290_v10 = vsel %vm225_vm0, %v211_v39, 0  ;;  %v763_v39 = vand.u32 4294901760, %v1725_v25 }
  0x6d   : > { %v753_v9 = vand.u32 4294901760, %v752_v13  ;;  %v1743_v32 = vand.u32 4294901760, %v290_v10 }
  0x6e   : > { %636 = vmatpush.xpose.msrb.mxu1 %v1385_v12  ;;  %583 = vmatpush.xpose.msrb.mxu0 %v398_v46  ;;  %v1731_v12 = vsub.f32 %v227_v52, %v1715_v8  ;;  %v1750_v52 = vsub.f32 %v293_v33, %v1727_v15  ;;  %v764_v13 = vsub.f32 %v1725_v25, %v763_v39 }
  0x6f   : > { %742 = vmatpush.xpose.msrb.mxu3 %v741_v14  ;;  %463 = vmatmul.f32.vlgmr.msra.gmra.mxu1 %v1715_v8  ;;  %v758_v14 = vsub.f32 %v1704_v16, %v1998_v41  ;;  %v1764_v33 = vsub.f32 %v290_v10, %v1743_v32 }
  0x70   : > { %677 = vmatpush.xpose.msrb.mxu2 %v1647_v11  ;;  %v1738_v46 = vand.u32 4294901760, %v1731_v12 }
  0x71   : > { %517 = vmatmul.f32.vlgmr.msra.gmra.mxu2 %v1731_v12 }
  0x72   : > { %638 = vmatpush.xpose.msrb.mxu1 %v1403_v20  ;;  %587 = vmatpush.xpose.msrb.mxu0 %v404_v49  ;;  %v360_v4 = vsub.f32 %v1731_v12, %v1738_v46  ;;  %v287_v20 = vsel %vm225_vm0, %v210_v40, 0  ;;  %v1999_v40 = vand.u32 4294901760, %v1750_v52 }
  0x73   : > { %748 = vmatpush.xpose.msrb.mxu3 %v747_v18  ;;  %v759_v18 = vand.u32 4294901760, %v758_v14  ;;  %v1770_v41 = vand.u32 4294901760, %v287_v20 }
  0x74   : > { %679 = vmatpush.xpose.msrb.mxu2 %v1654_v45  ;;  %556 = vmatmul.f32.vlgmr.msra.gmra.mxu3 %v1738_v46  ;;  %v1758_v49 = vand.u32 4294901760, %v360_v4  ;;  %v765_v4 = vand.u32 4294901760, %v764_v13  ;;  %v770_v10 = vsub.f32 %v1750_v52, %v1999_v40 }
  0x76   : > { %640 = vmatpush.xpose.msrb.mxu1 %v1420_v28  ;;  %591 = vmatpush.xpose.msrb.mxu0 %v410_v57  ;;  %v284_v28 = vsel %vm225_vm0, %v209_v42, 0  ;;  %v775_v57 = vand.u32 4294901760, %v1764_v33  ;;  %v207_v42 = vld [vmem:[%s1368_s28 + $0x80] sm:$0xff] }
  0x77   : > { %754 = vmatpush.xpose.msrb.mxu3 %v753_v9  ;;  %362 = vmatmul.f32.vlgmr.msra.gmra.mxu0 %v1758_v49  ;;  %v1784_v9 = vsub.f32 %v287_v20, %v1770_v41  ;;  %v1786_v14 = vand.u32 4294901760, %v284_v28 }
  0x78   : > { %681 = vmatpush.xpose.msrb.mxu2 %v1672_v58 }
  0x79   : > { %v781_v20 = vand.u32 4294901760, %v1784_v9  ;;  %v1799_v13 = vsub.f32 %v284_v28, %v1786_v14 }
  0x7a   : > { %642 = vmatpush.xpose.msrb.mxu1 %v1434_v35  ;;  %595 = vmatpush.xpose.msrb.mxu0 %v416_v1  ;;  %v281_v35 = vsel %vm225_vm0, %v208_v50, 0  ;;  %v776_v1 = vsub.f32 %v1764_v33, %v775_v57 }
  0x7b   : > { %760 = vmatpush.xpose.msrb.mxu3 %v759_v18  ;;  %v771_v18 = vand.u32 4294901760, %v770_v10  ;;  %v1801_v40 = vand.u32 4294901760, %v281_v35  ;;  %v787_v28 = vand.u32 4294901760, %v1799_v13 }
  0x7c   : > { %683 = vmatpush.xpose.msrb.mxu2 %v1688_v37  ;;  %v777_v50 = vand.u32 4294901760, %v776_v1 }
  0x7d   : > { %v1813_v10 = vsub.f32 %v281_v35, %v1801_v40 }
  0x7e   : > { %644 = vmatpush.xpose.msrb.mxu1 %v1451_v43  ;;  %599 = vmatpush.xpose.msrb.mxu0 %v2002_v59  ;;  %v278_v43 = vsel %vm225_vm0, %v207_v42, 0  ;;  %v788_v42 = vsub.f32 %v1799_v13, %v787_v28 }
  0x7f   : > { %766 = vmatpush.xpose.msrb.mxu3 %v765_v4  ;;  %v782_v4 = vsub.f32 %v1784_v9, %v781_v20  ;;  %v1815_v59 = vand.u32 4294901760, %v278_v43  ;;  %v793_v1 = vand.u32 4294901760, %v1813_v10 }
  0x80   : > { %685 = vmatpush.xpose.msrb.mxu2 %v1706_v44 }
  0x81   : > { %v783_v17 = vand.u32 4294901760, %v782_v4  ;;  %v1826_v35 = vsub.f32 %v278_v43, %v1815_v59  ;;  %v2006_v43 = vand.u32 4294901760, %v1559_v63  ;;  %v2011_v63 = vand.u32 4294901760, %v1604_v61 }
  0x82   : > { %646 = vmatpush.xpose.msrb.mxu1 %v1470_v53  ;;  %603 = vmatpush.xpose.msrb.mxu0 %v2003_v2  ;;  %v2004_v53 = vand.u32 4294901760, %v1519_v23  ;;  %v789_v23 = vand.u32 4294901760, %v788_v42 }
  0x83   : > { %772 = vmatpush.xpose.msrb.mxu3 %v771_v18  ;;  %v794_v18 = vsub.f32 %v1813_v10, %v793_v1  ;;  %v799_v2 = vand.u32 4294901760, %v1826_v35 }
  0x84   : > { %687 = vmatpush.xpose.msrb.mxu2 %v1727_v15 }
  0x86   : > { %648 = vmatpush.xpose.msrb.mxu1 %v1484_v60  ;;  %607 = vmatpush.xpose.msrb.mxu0 %v2004_v53  ;;  %v2005_v60 = vand.u32 4294901760, %v1541_v47  ;;  %v800_v47 = vsub.f32 %v1826_v35, %v799_v2 }
  0x87   : > { %778 = vmatpush.xpose.msrb.mxu3 %v777_v50  ;;  %v2007_v50 = vand.u32 4294901760, %v1578_v27 }
  0x88   : > { %689 = vmatpush.xpose.msrb.mxu2 %v1743_v32  ;;  %v801_v4 = vand.u32 4294901760, %v800_v47  ;;  %v223_v47 = vld [vmem:[%s188_s8] sm:$0x3] }
  0x8a   : > { %650 = vmatpush.xpose.msrb.mxu1 %v1498_v3  ;;  %611 = vmatpush.xpose.msrb.mxu0 %v2005_v60  ;;  %v795_v3 = vand.u32 4294901760, %v794_v18 }
  0x8b   : > { %784 = vmatpush.xpose.msrb.mxu3 %v783_v17 }
  0x8c   : > { %691 = vmatpush.xpose.msrb.mxu2 %v1770_v41 }
  0x8e   : > { %652 = vmatpush.xpose.msrb.mxu1 %v1504_v6  ;;  %615 = vmatpush.xpose.msrb.mxu0 %v2006_v43  ;;  %v2008_v6 = vand.u32 4294901760, %v1598_v55 }
  0x8f   : > { %790 = vmatpush.xpose.msrb.mxu3 %v789_v23 }
  0x90   : > { %693 = vmatpush.xpose.msrb.mxu2 %v1786_v14 }
  0x92   : > { %654 = vmatpush.xpose.msrb.mxu1 %v1526_v30  ;;  %619 = vmatpush.xpose.msrb.mxu0 %v2007_v50  ;;  %v2009_v30 = vand.u32 4294901760, %v1569_v7 }
  0x93   : > { %796 = vmatpush.xpose.msrb.mxu3 %v795_v3 }
  0x94   : > { %695 = vmatpush.xpose.msrb.mxu2 %v1801_v40 }
  0x96   : > { %656 = vmatpush.xpose.msrb.mxu1 %v1543_v48  ;;  %623 = vmatpush.xpose.msrb.mxu0 %v2008_v6  ;;  %v2010_v48 = vand.u32 4294901760, %v1585_v36 }
  0x97   : > { %802 = vmatpush.xpose.msrb.mxu3 %v801_v4 }
  0x98   : > { %697 = vmatpush.xpose.msrb.mxu2 %v1815_v59 }
  0x99   : > { %625 = vmatmul.f32.vlgmr.msrb.gmra.mxu0 %v1715_v8 }
  0x9a   : > { %810 = vmatpush.xpose.msra.mxu0 %v1569_v7  ;;  %658 = vmatpush.xpose.msrb.mxu1 %v1561_v0  ;;  %v2013_v0 = vand.u32 4294901760, %v1686_v24  ;;  %v2015_v7 = vand.u32 4294901760, %v1750_v52 }
  0x9b   : > { %971 = vmatpush.xpose.msra.mxu3 %v1549_v54  ;;  %703 = vmatmul.f32.vlgmr.msrb.gmra.mxu2 %v1758_v49 }
  0x9c   : > { %904 = vmatpush.xpose.msra.mxu2 %v2009_v30  ;;  %804 = vmatmul.f32.vlgmr.msrb.gmra.mxu3 %v1715_v8 }
  0x9e   : > { %813 = vmatpush.xpose.msra.mxu0 %v1585_v36  ;;  %660 = vmatpush.xpose.msrb.mxu1 %v1580_v31 }
  0x9f   : > { %973 = vmatpush.xpose.msra.mxu3 %v1565_v5 }
  0xa0   : > { %908 = vmatpush.xpose.msra.mxu2 %v2010_v48 }
  0xa1   : > { %662 = vmatmul.f32.vlgmr.msrb.gmra.mxu1 %v1715_v8 }
  0xa2   : > { %863 = vmatpush.xpose.msra.mxu1 %v1549_v54  ;;  %816 = vmatpush.xpose.msra.mxu0 %v1604_v61  ;;  %v2012_v54 = vand.u32 4294901760, %v1670_v19 }
  0xa3   : > { %975 = vmatpush.xpose.msra.mxu3 %v1587_v38 }
  0xa4   : > { %912 = vmatpush.xpose.msra.mxu2 %v2011_v63 }
  0xa6   : > { %865 = vmatpush.xpose.msra.mxu1 %v1565_v5  ;;  %819 = vmatpush.xpose.msra.mxu0 %v1626_v51  ;;  %v2014_v5 = vand.u32 4294901760, %v1704_v16 }
  0xa7   : > { %977 = vmatpush.xpose.msra.mxu3 %v1610_v22 }
  0xa8   : > { %916 = vmatpush.xpose.msra.mxu2 %v727_v21 }
  0xaa   : > { %867 = vmatpush.xpose.msra.mxu1 %v1587_v38  ;;  %822 = vmatpush.xpose.msra.mxu0 %v1645_v34 }
  0xab   : > { %979 = vmatpush.xpose.msra.mxu3 %v1628_v56 }
  0xac   : > { %920 = vmatpush.xpose.msra.mxu2 %v733_v26 }
  0xae   : > { %869 = vmatpush.xpose.msra.mxu1 %v1610_v22  ;;  %825 = vmatpush.xpose.msra.mxu0 %v1661_v29 }
  0xaf   : > { %981 = vmatpush.xpose.msra.mxu3 %v1647_v11 }
  0xb0   : > { %924 = vmatpush.xpose.msra.mxu2 %v739_v62 }
  0xb2   : > { %871 = vmatpush.xpose.msra.mxu1 %v1628_v56  ;;  %828 = vmatpush.xpose.msra.mxu0 %v1670_v19 }
  0xb3   : > { %983 = vmatpush.xpose.msra.mxu3 %v1654_v45 }
  0xb4   : > { %928 = vmatpush.xpose.msra.mxu2 %v2012_v54 }
  0xb6   : > { %873 = vmatpush.xpose.msra.mxu1 %v1647_v11  ;;  %831 = vmatpush.xpose.msra.mxu0 %v1686_v24 }
  0xb7   : > { %985 = vmatpush.xpose.msra.mxu3 %v1672_v58 }
  0xb8   : > { %932 = vmatpush.xpose.msra.mxu2 %v2013_v0 }
  0xba   : > { %875 = vmatpush.xpose.msra.mxu1 %v1654_v45  ;;  %834 = vmatpush.xpose.msra.mxu0 %v1704_v16 }
  0xbb   : > { %987 = vmatpush.xpose.msra.mxu3 %v1688_v37 }
  0xbc   : > { %936 = vmatpush.xpose.msra.mxu2 %v2014_v5 }
  0xbe   : > { %877 = vmatpush.xpose.msra.mxu1 %v1672_v58  ;;  %837 = vmatpush.xpose.msra.mxu0 %v1725_v25 }
  0xbf   : > { %989 = vmatpush.xpose.msra.mxu3 %v1706_v44 }
  0xc0   : > { %940 = vmatpush.xpose.msra.mxu2 %v763_v39 }
  0xc2   : > { %879 = vmatpush.xpose.msra.mxu1 %v1688_v37  ;;  %840 = vmatpush.xpose.msra.mxu0 %v1750_v52 }
  0xc3   : > { %991 = vmatpush.xpose.msra.mxu3 %v1727_v15 }
  0xc4   : > { %944 = vmatpush.xpose.msra.mxu2 %v2015_v7 }
  0xc6   : > { %881 = vmatpush.xpose.msra.mxu1 %v1706_v44  ;;  %843 = vmatpush.xpose.msra.mxu0 %v1764_v33 }
  0xc7   : > { %993 = vmatpush.xpose.msra.mxu3 %v1743_v32 }
  0xc8   : > { %948 = vmatpush.xpose.msra.mxu2 %v775_v57 }
  0xca   : > { %883 = vmatpush.xpose.msra.mxu1 %v1727_v15  ;;  %846 = vmatpush.xpose.msra.mxu0 %v1784_v9 }
  0xcb   : > { %995 = vmatpush.xpose.msra.mxu3 %v1770_v41 }
  0xcc   : > { %952 = vmatpush.xpose.msra.mxu2 %v781_v20 }
  0xce   : > { %885 = vmatpush.xpose.msra.mxu1 %v1743_v32  ;;  %849 = vmatpush.xpose.msra.mxu0 %v1799_v13 }
  0xcf   : > { %997 = vmatpush.xpose.msra.mxu3 %v1786_v14 }
  0xd0   : > { %956 = vmatpush.xpose.msra.mxu2 %v787_v28 }
  0xd2   : > { %887 = vmatpush.xpose.msra.mxu1 %v1770_v41  ;;  %852 = vmatpush.xpose.msra.mxu0 %v1813_v10 }
  0xd3   : > { %999 = vmatpush.xpose.msra.mxu3 %v1801_v40 }
  0xd4   : > { %960 = vmatpush.xpose.msra.mxu2 %v793_v1 }
  0xd6   : > { %889 = vmatpush.xpose.msra.mxu1 %v1786_v14  ;;  %855 = vmatpush.xpose.msra.mxu0 %v1826_v35 }
  0xd7   : > { %1001 = vmatpush.xpose.msra.mxu3 %v1815_v59 }
  0xd8   : > { %964 = vmatpush.xpose.msra.mxu2 %v799_v2 }
  0xd9   : > { %858 = vmatmul.f32.vlgmr.msra.gmra.mxu0 %v1731_v12 }
  0xda   : > { %891 = vmatpush.xpose.msra.mxu1 %v1801_v40  ;;  %1003 = vmatmul.f32.vlgmr.msra.gmra.mxu3 %v1715_v8 }
  0xdb   : > { %966 = vmatmul.f32.vlgmr.msra.gmra.mxu2 %v1715_v8 }
  0xde   : > { %893 = vmatpush.xpose.msra.mxu1 %v1815_v59 }
  0xe1   : > { %897 = vmatmul.f32.vlgmr.msra.gmra.mxu1 %v1738_v46 }
  0xec   : > { %v464_v26 = vpop.f32.mrf.mxu1 }
  0xf4   : > { %v363_v27 = vpop.f32.mrf.mxu0  ;;  %v518_v36 = vpop.f32.mrf.mxu2 }
  0xf5   : > { %v465_v31 = vadd.f32 %v464_v26, %v363_v27 }
  0xf7   : > { %v519_v38 = vadd.f32 %v518_v36, %v465_v31  ;;  %v557_v55 = vpop.f32.mrf.mxu3 }
  0xf9   : > { %v558_v61 = vadd.f32 %v557_v55, %v519_v38 }
 0x116   : > { %v626_v22 = vpop.f32.mrf.mxu0 }
 0x117   : > { %v627_v51 = vadd.f32 %v626_v22, %v558_v61  ;;  %v1088_v61 = vlaneseq }
 0x119   : > { %vm1090_vm4 = vcmp.lt.s32.totalorder %v1088_v61, 256 }
 0x11e   : > { %v663_v56 = vpop.f32.mrf.mxu1  ;;  %v704_v34 = vpop.f32.mrf.mxu2 }
 0x11f   : > { %v664_v21 = vadd.f32 %v663_v56, %v627_v51  ;;  %v805_v11 = vpop.f32.mrf.mxu3 }
 0x120   : > { %v806_v19 = vadd.f32 %v805_v11, %v704_v34 }
 0x121   : > { %v1023_v45 = vrot.slane %v664_v21, 4  ;;  %v1027_v29 = vrot.slane %v664_v21, 3  ;;  %vm1019_vm1 = vcmp.lt.f32.partialorder %v664_v21, 0.0  ;;  %v1007_v8 = vmax.f32 %v664_v21, 0.0 }
 0x123   : > { %v1031_v62 = vsel %vm1019_vm1, %v1023_v45, %v1027_v29  ;;  %v1009_v32 = vmul.f32 %v1007_v8, %v1007_v8 }
 0x124   : > { %v1033_v16 = vsub.f32 8.0, %v1031_v62 }
 0x125   : > { %v1013_v9 = vrot.slane %v1009_v32, 1 }
 0x126   : > { %v1035_v12 = vmul.f32 %v1033_v16, %v1033_v16 }
 0x127   : > { %v1017_v59 = vsub.f32 %v1009_v32, %v1013_v9 }
 0x128   : > { %v1037_v33 = vsub.f32 128.0, %v1035_v12 }
 0x129   : > { %v1045_v60 = vrot.slane %v1017_v59, 2 }
 0x12a   : > { %v1039_v28 = vmul.f32 0.0078125, %v1037_v33 }
 0x12b   : > { %v1049_v43 = vadd.f32 %v1045_v60, %v664_v21 }
 0x12c   : > { %v1041_v42 = vmul.f32 %v1039_v28, %v664_v21 }
 0x12e   : > { %v1053_v18 = vrot.slane %v1041_v42, 1 }
 0x130   : > { %v1057_v50 = vsub.f32 %v1049_v43, %v1053_v18 }
 0x156   : > { %v859_v58 = vpop.f32.mrf.mxu0 }
 0x157   : > { %v860_v15 = vadd.f32 %v859_v58, %v806_v19 }
 0x15d   : > { %v1004_v41 = vpop.f32.mrf.mxu3 }
 0x15e   : > { %v898_v24 = vpop.f32.mrf.mxu1  ;;  %v967_v37 = vpop.f32.mrf.mxu2 }
 0x15f   : > { %v899_v44 = vadd.f32 %v898_v24, %v860_v15 }
 0x161   : > { %v968_v25 = vadd.f32 %v967_v37, %v899_v44 }
 0x163   : > { %v1005_v46 = vadd.f32 %v1004_v41, %v968_v25 }
 0x165   : > { %v1008_v39 = vmax.f32 %v1005_v46, 0.0  ;;  %vm1020_vm2 = vcmp.lt.f32.partialorder %v1005_v46, 0.0  ;;  %v1024_v52 = vrot.slane %v1005_v46, 4  ;;  %v1028_v49 = vrot.slane %v1005_v46, 3 }
 0x167   : > { %v1010_v40 = vmul.f32 %v1008_v39, %v1008_v39  ;;  %v1032_v57 = vsel %vm1020_vm2, %v1024_v52, %v1028_v49 }
 0x168   : > { %v1034_v14 = vsub.f32 8.0, %v1032_v57 }
 0x169   : > { %v1014_v20 = vrot.slane %v1010_v40, 1 }
 0x16a   : > { %v1036_v13 = vmul.f32 %v1034_v14, %v1034_v14 }
 0x16b   : > { %v1018_v10 = vsub.f32 %v1010_v40, %v1014_v20 }
 0x16c   : > { %v1038_v53 = vsub.f32 128.0, %v1036_v13 }
 0x16d   : > { %v1046_v1 = vrot.slane %v1018_v10, 2 }
 0x16e   : > { %v1040_v17 = vmul.f32 0.0078125, %v1038_v53 }
 0x16f   : > { %v1050_v23 = vadd.f32 %v1046_v1, %v1005_v46 }
 0x170   : > { %v1042_v35 = vmul.f32 %v1040_v17, %v1005_v46 }
 0x172   : > { %v1054_v2 = vrot.slane %v1042_v35, 1 }
 0x174   : > { %v1058_v3 = vsub.f32 %v1050_v23, %v1054_v2 }
 0x176   : > { %v1061_v4 = vrot.slane %v1058_v3, 7 }
 0x178   : > { %v1063_v6 = vsel %vm1062_vm3, %v1057_v50, %v1061_v4 }
 0x179   : > { %v1065_v30 = vmul.f32 %v1063_v6, %v223_v47 }
 0x17b   : > { %v1067_v48 = vperm.slane %v1065_v30, 0  ;;  %v1068_v63 = vperm.slane %v1065_v30, 1 }
 0x17d   : > { %v1071_v54 = vadd.f32 %v1067_v48, %v1041_v42  ;;  %v1072_v0 = vadd.f32 %v1068_v63, %v1042_v35 }
 0x17f   : > { %v1073_v5 = vmul.f32 0.5, %v1071_v54  ;;  %v1074_v7 = vmul.f32 0.5, %v1072_v0 }
 0x181   : > { %1228 = vtanh.f32 %v1073_v5 }
 0x182   : > { %1230 = vtanh.f32 %v1074_v7 }
 0x187   : > { %v1229_v26 = vpop.eup %1228 }
 0x188   : > { %v1231_v27 = vpop.eup %1230  ;;  %v1077_v31 = vmul.f32 0.5, %v1229_v26 }
 0x189   : > { %v1078_v36 = vmul.f32 0.5, %v1231_v27 }
 0x18a   : > { %v1079_v38 = vadd.f32 0.5, %v1077_v31 }
 0x18b   : > { %v1080_v55 = vadd.f32 0.5, %v1078_v36 }
 0x18c   : > { %1083 = vst [vmem:[#allocation1] sm:$0xff] %v1079_v38 }
 0x18d   : > { %1084 = vst [vmem:[#allocation1 + $0x9] sm:$0xff] %v1080_v55 }
 0x194   : > { %v1086_v22 = vld [vmem:[#allocation1 + $0x1] ss:$9 sm:$0xff] }
 0x195   : > { %1092 = vst.msk [vmem:[%s178_s19] sm:$0x3] %vm1090_vm4, %v1086_v22 }
 0x196   : > { %1259 = shalt.err (!%p1256_p4)
}
 0x197   : > { %1189 = dma.vmem_to_hbm [thread:$0]  (%p1354_p5), %s1107_s20, 32, %s1109_s24, %s1094_s25  }
 0x198 PF: > { %p1195_p7 = scmp.ge.s32.totalorder %s1294_s15, 2  ;;  %s1120_s6 = sand.u32 1, %s1282_s12  }
 0x199   : > { %s1121_s7 = scalar_lea.sflag [#allocation3], %s1120_s6 }
 0x19a   : > { %p1192_p8 = pnand %p1195_p7, %p1358_p6 }
 0x19c   : > { %p1193_p9 = pneg %p1192_p8 }
 0x19e   : > { %1277 = dma.done.wait (%p1193_p9), %s1121_s7, 32  }
 0x19f   : > { %1279 = vsyncadd (%p1193_p9), %s1121_s7, 4294967264  ;;  %p13_p10 = scmp.ge.s32.totalorder %s1341_s18, 4   ;;  %s2016_s12 = smov %s1286_s13 }
 0x1a0   : > { %s2017_s13 = smov %s1290_s14  ;;  %s2018_s14 = smov %s1352_s21 }
 0x1a1   : > { %s2019_s15 = smov %s1341_s18  ;;  %15 = sbr.rel (!%p13_p10) target bundleno = 3 (0x3), region = 71 }
 0x1a6   :  { %1127 = vsyncpa [#allocation3], 1 }
 0x1a7   :  { %1129 = vsyncpa [#allocation3 + $0x1], 1 }

</bundles_post_ra>
